<compile_context>
chip_gen: v5e
topology: v5e:2x2
jax: 0.10.0
libtpu: 0.0.40
codegen_flags: <defaults>
</compile_context>

<pallas_src>
import functools

import numpy as np
import jax
import jax.numpy as jnp
from jax import lax
from jax.experimental import pallas as pl
from jax.experimental.pallas import tpu as pltpu


def _hanning_taps(filter_size):
    """Separable 1-D taps b with outer(b, b) == normalized 2-D Hanning filter."""
    a = np.hanning(filter_size)[1:-1].astype(np.float64)
    return (a / a.sum()).astype(np.float32)


def _make_downsample_matrix(out_size, in_size, taps, stride, pad):
    """A[i, j] = taps[k] where j = i*stride + k - pad (zero outside bounds)."""
    A = np.zeros((out_size, in_size), dtype=np.float32)
    for i in range(out_size):
        for k in range(len(taps)):
            j = i * stride + k - pad
            if 0 <= j < in_size:
                A[i, j] += taps[k]
    return A


def _pick_c_block(C, H, W, itemsize=4, budget_bytes=8 << 20):
    """Channel tile: lane-dense (multiple of 128) when possible, VMEM-budgeted."""
    def fits(cb):
        return H * W * cb * itemsize <= budget_bytes

    # Prefer multiples of 128 that evenly divide C (full lane occupancy).
    for cb in range(C - (C % 128), 0, -128):
        if C % cb == 0 and fits(cb):
            return cb
    # Fallback: largest divisor of C that fits (C itself for small channel counts).
    for cb in range(C, 0, -1):
        if C % cb == 0 and fits(cb):
            return cb
    return C


def _l2pool_kernel(aw_ref, x_ref, o_ref, *, taps, stride, padding, h_in, h_out):
    """One (image, channel-block) grid step.

    aw_ref : (Wo, W)          W-direction taps with stride / zero-pad folded in
    x_ref  : (1, H, W, Cb)    channels-last input block (channels on lanes)
    o_ref  : (1, Ho, Wo, Cb)  channels-last output block (channels on lanes)
    """
    aw = aw_ref[...]                                    # tiny, resident across steps
    x = x_ref[0, :, :, :]                               # (H, W, Cb)
    sq = x * x                                          # square whole block once (VPU)

    # NOTE: static (unrolled) row loop -- fine for typical feature-map sizes; for very
    # large Ho this trades compile time for full LLO scheduling visibility.
    for i in range(h_out):
        # H-direction 3-tap conv (stride / zero padding resolved statically) on the VPU.
        acc = None
        for k, t in enumerate(taps):
            r = i * stride + k - padding
            if 0 <= r < h_in:
                term = sq[r, :, :] * t                  # (W, Cb), lanes = channels
                acc = term if acc is None else acc + term
        # W-direction conv as a single lane-dense matmul: (Wo, W) @ (W, Cb) -> (Wo, Cb).
        pooled = jnp.dot(aw, acc, preferred_element_type=jnp.float32)
        o_ref[0, i, :, :] = jnp.sqrt(pooled + 1e-12).astype(o_ref.dtype)


def l2pooling(x, *, filter_size=5, stride=2, pad_off=0):
    """x: (N, C, H, W) float32 (PyTorch NCHW). Returns (N, C, Ho, Wo) float32."""
    del pad_off  # the PyTorch module accepts pad_off but never uses it
    N, C, H, W = x.shape
    padding = (filter_size - 2) // 2
    ksize = filter_size - 2

    b = _hanning_taps(filter_size)                      # length ksize (3 for f=5)
    Ho = (H + 2 * padding - ksize) // stride + 1
    Wo = (W + 2 * padding - ksize) // stride + 1
    Aw = jnp.asarray(_make_downsample_matrix(Wo, W, b, stride, padding))  # (Wo, W)

    # Channels-last view so C sits on the lane axis inside the kernel (lane-dense).
    x_nhwc = jnp.transpose(x, (0, 2, 3, 1))             # (N, H, W, C)

    c_blk = _pick_c_block(C, H, W)
    num_cb = C // c_blk

    kernel = functools.partial(
        _l2pool_kernel,
        taps=tuple(float(t) for t in b),
        stride=stride,
        padding=padding,
        h_in=H,
        h_out=Ho,
    )

    flops = int(N * C * (H * W + Ho * W * len(b) * 2 + Ho * Wo * W * 2))
    bytes_accessed = int(4 * N * C * (H * W + Ho * Wo) + 4 * Wo * W)

    out_nhwc = pl.pallas_call(
        kernel,
        out_shape=jax.ShapeDtypeStruct((N, Ho, Wo, C), jnp.float32),
        grid_spec=pltpu.PrefetchScalarGridSpec(
            num_scalar_prefetch=0,
            grid=(N, num_cb),
            in_specs=[
                pl.BlockSpec((Wo, W), lambda n, c: (0, 0)),            # constant block
                pl.BlockSpec((1, H, W, c_blk), lambda n, c: (n, 0, 0, c)),
            ],
            out_specs=pl.BlockSpec((1, Ho, Wo, c_blk), lambda n, c: (n, 0, 0, c)),
        ),
        compiler_params=pltpu.CompilerParams(
            dimension_semantics=("parallel", "parallel"),
            vmem_limit_bytes=64 * 1024 * 1024,
        ),
        cost_estimate=pl.CostEstimate(
            flops=flops,
            transcendentals=int(N * C * Ho * Wo),
            bytes_accessed=bytes_accessed,
        ),
    )(Aw, x_nhwc)

    # Back to the PyTorch NCHW layout.
    return jnp.transpose(out_nhwc, (0, 3, 1, 2))


def _reference(x, g, *, stride=2, padding=1):
    """Pure-JAX reference mirroring F.conv2d(x**2, g, stride, padding, groups=C)."""
    N, C, H, W = x.shape
    w = jnp.broadcast_to(g[None, None, :, :], (C, 1, g.shape[0], g.shape[1]))
    out = lax.conv_general_dilated(
        x * x,
        w,
        window_strides=(stride, stride),
        padding=((padding, padding), (padding, padding)),
        feature_group_count=C,
        dimension_numbers=("NCHW", "OIHW", "NCHW"),
    )
    return jnp.sqrt(out + 1e-12)


if __name__ == "__main__":
    key = jax.random.PRNGKey(0)
    N, C, H, W = 2, 4, 16, 16
    x = jax.random.normal(key, (N, C, H, W), dtype=jnp.float32)

    out = jax.block_until_ready(l2pooling(x, filter_size=5, stride=2))

    b = _hanning_taps(5)
    g = jnp.asarray(np.outer(b, b).astype(np.float32))
    ref = jax.block_until_ready(_reference(x, g, stride=2, padding=1))

    np.testing.assert_allclose(np.asarray(out), np.asarray(ref), rtol=1e-4, atol=1e-5)
    assert out.shape == (N, C, 8, 8)
    print("KERNEL_OK")
</pallas_src>

<mosaic_0001>
module attributes {stable_mosaic.version = 11 : i64} {
  func.func @_l2pool_kernel(%arg0: i32, %arg1: i32, %arg2: memref<8x16xf32, #tpu.memory_space<vmem>>, %arg3: memref<1x16x16x4xf32, #tpu.memory_space<vmem>>, %arg4: memref<1x8x8x4xf32, #tpu.memory_space<vmem>>) attributes {dimension_semantics = [#tpu.dimension_semantics<parallel>, #tpu.dimension_semantics<parallel>], iteration_bounds = array<i64: 2, 1>, scalar_prefetch = 0 : i64, scratch_operands = 0 : i64, tpu.core_type = #tpu.core_type<tc>, window_params = [{pipeline_mode = #tpu.pipeline_mode<synchronous>, transform_indices = @transform_0, window_bounds = array<i64: 8, 16>}, {transform_indices = @transform_1, window_bounds = array<i64: 1, 16, 16, 4>}, {transform_indices = @transform_2, window_bounds = array<i64: 1, 8, 8, 4>}]} {
    %c0 = arith.constant 0 : index
    %c0_0 = arith.constant 0 : index
    %0 = vector.load %arg2[%c0, %c0_0] : memref<8x16xf32, #tpu.memory_space<vmem>>, vector<8x16xf32>
    %c0_1 = arith.constant 0 : index
    %c0_2 = arith.constant 0 : index
    %c0_3 = arith.constant 0 : index
    %c0_4 = arith.constant 0 : index
    %1 = vector.load %arg3[%c0_1, %c0_2, %c0_3, %c0_4] : memref<1x16x16x4xf32, #tpu.memory_space<vmem>>, vector<1x16x16x4xf32>
    %2 = vector.shape_cast %1 : vector<1x16x16x4xf32> to vector<16x16x4xf32>
    %3 = arith.mulf %2, %2 : vector<16x16x4xf32>
    %4 = vector.extract_strided_slice %3 {offsets = [0, 0, 0], sizes = [1, 16, 4], strides = [1, 1, 1]} : vector<16x16x4xf32> to vector<1x16x4xf32>
    %5 = vector.shape_cast %4 : vector<1x16x4xf32> to vector<16x4xf32>
    %cst = arith.constant 5.000000e-01 : f32
    %6 = vector.broadcast %cst : f32 to vector<16x4xf32>
    %7 = arith.mulf %5, %6 : vector<16x4xf32>
    %8 = vector.extract_strided_slice %3 {offsets = [1, 0, 0], sizes = [1, 16, 4], strides = [1, 1, 1]} : vector<16x16x4xf32> to vector<1x16x4xf32>
    %9 = vector.shape_cast %8 : vector<1x16x4xf32> to vector<16x4xf32>
    %cst_5 = arith.constant 2.500000e-01 : f32
    %10 = vector.broadcast %cst_5 : f32 to vector<16x4xf32>
    %11 = arith.mulf %9, %10 : vector<16x4xf32>
    %12 = arith.addf %7, %11 : vector<16x4xf32>
    %cst_6 = arith.constant dense<0.000000e+00> : vector<8x4xf32>
    %13 = tpu.matmul %0, %12, %cst_6 {dimension_numbers = #tpu.dot_dimension_numbers<[1], [0], [0], [1], [0, 0, 1, 1], [], []>} : vector<8x16xf32>, vector<16x4xf32>, vector<8x4xf32> -> vector<8x4xf32>
    %cst_7 = arith.constant 9.99999996E-13 : f32
    %14 = vector.broadcast %cst_7 : f32 to vector<8x4xf32>
    %15 = arith.addf %13, %14 : vector<8x4xf32>
    %16 = math.sqrt %15 : vector<8x4xf32>
    %c0_8 = arith.constant 0 : index
    %c0_9 = arith.constant 0 : index
    %c0_10 = arith.constant 0 : index
    %c0_11 = arith.constant 0 : index
    %17 = vector.load %arg4[%c0_8, %c0_9, %c0_10, %c0_11] : memref<1x8x8x4xf32, #tpu.memory_space<vmem>>, vector<1x1x8x4xf32>
    %18 = vector.shape_cast %17 : vector<1x1x8x4xf32> to vector<8x4xf32>
    %19 = vector.shape_cast %16 : vector<8x4xf32> to vector<1x1x8x4xf32>
    tpu.vector_store %arg4[%c0_8, %c0_9, %c0_10, %c0_11], %19 {strides = array<i32>} : memref<1x8x8x4xf32, #tpu.memory_space<vmem>>, vector<1x1x8x4xf32>,
    %20 = vector.extract_strided_slice %3 {offsets = [1, 0, 0], sizes = [1, 16, 4], strides = [1, 1, 1]} : vector<16x16x4xf32> to vector<1x16x4xf32>
    %21 = vector.shape_cast %20 : vector<1x16x4xf32> to vector<16x4xf32>
    %cst_12 = arith.constant 2.500000e-01 : f32
    %22 = vector.broadcast %cst_12 : f32 to vector<16x4xf32>
    %23 = arith.mulf %21, %22 : vector<16x4xf32>
    %24 = vector.extract_strided_slice %3 {offsets = [2, 0, 0], sizes = [1, 16, 4], strides = [1, 1, 1]} : vector<16x16x4xf32> to vector<1x16x4xf32>
    %25 = vector.shape_cast %24 : vector<1x16x4xf32> to vector<16x4xf32>
    %cst_13 = arith.constant 5.000000e-01 : f32
    %26 = vector.broadcast %cst_13 : f32 to vector<16x4xf32>
    %27 = arith.mulf %25, %26 : vector<16x4xf32>
    %28 = arith.addf %23, %27 : vector<16x4xf32>
    %29 = vector.extract_strided_slice %3 {offsets = [3, 0, 0], sizes = [1, 16, 4], strides = [1, 1, 1]} : vector<16x16x4xf32> to vector<1x16x4xf32>
    %30 = vector.shape_cast %29 : vector<1x16x4xf32> to vector<16x4xf32>
    %cst_14 = arith.constant 2.500000e-01 : f32
    %31 = vector.broadcast %cst_14 : f32 to vector<16x4xf32>
    %32 = arith.mulf %30, %31 : vector<16x4xf32>
    %33 = arith.addf %28, %32 : vector<16x4xf32>
    %cst_15 = arith.constant dense<0.000000e+00> : vector<8x4xf32>
    %34 = tpu.matmul %0, %33, %cst_15 {dimension_numbers = #tpu.dot_dimension_numbers<[1], [0], [0], [1], [0, 0, 1, 1], [], []>} : vector<8x16xf32>, vector<16x4xf32>, vector<8x4xf32> -> vector<8x4xf32>
    %cst_16 = arith.constant 9.99999996E-13 : f32
    %35 = vector.broadcast %cst_16 : f32 to vector<8x4xf32>
    %36 = arith.addf %34, %35 : vector<8x4xf32>
    %37 = math.sqrt %36 : vector<8x4xf32>
    %c0_17 = arith.constant 0 : index
    %c1 = arith.constant 1 : index
    %c0_18 = arith.constant 0 : index
    %c0_19 = arith.constant 0 : index
    %38 = vector.load %arg4[%c0_17, %c1, %c0_18, %c0_19] : memref<1x8x8x4xf32, #tpu.memory_space<vmem>>, vector<1x1x8x4xf32>
    %39 = vector.shape_cast %38 : vector<1x1x8x4xf32> to vector<8x4xf32>
    %40 = vector.shape_cast %37 : vector<8x4xf32> to vector<1x1x8x4xf32>
    tpu.vector_store %arg4[%c0_17, %c1, %c0_18, %c0_19], %40 {strides = array<i32>} : memref<1x8x8x4xf32, #tpu.memory_space<vmem>>, vector<1x1x8x4xf32>,
    %41 = vector.extract_strided_slice %3 {offsets = [3, 0, 0], sizes = [1, 16, 4], strides = [1, 1, 1]} : vector<16x16x4xf32> to vector<1x16x4xf32>
    %42 = vector.shape_cast %41 : vector<1x16x4xf32> to vector<16x4xf32>
    %cst_20 = arith.constant 2.500000e-01 : f32
    %43 = vector.broadcast %cst_20 : f32 to vector<16x4xf32>
    %44 = arith.mulf %42, %43 : vector<16x4xf32>
    %45 = vector.extract_strided_slice %3 {offsets = [4, 0, 0], sizes = [1, 16, 4], strides = [1, 1, 1]} : vector<16x16x4xf32> to vector<1x16x4xf32>
    %46 = vector.shape_cast %45 : vector<1x16x4xf32> to vector<16x4xf32>
    %cst_21 = arith.constant 5.000000e-01 : f32
    %47 = vector.broadcast %cst_21 : f32 to vector<16x4xf32>
    %48 = arith.mulf %46, %47 : vector<16x4xf32>
    %49 = arith.addf %44, %48 : vector<16x4xf32>
    %50 = vector.extract_strided_slice %3 {offsets = [5, 0, 0], sizes = [1, 16, 4], strides = [1, 1, 1]} : vector<16x16x4xf32> to vector<1x16x4xf32>
    %51 = vector.shape_cast %50 : vector<1x16x4xf32> to vector<16x4xf32>
    %cst_22 = arith.constant 2.500000e-01 : f32
    %52 = vector.broadcast %cst_22 : f32 to vector<16x4xf32>
    %53 = arith.mulf %51, %52 : vector<16x4xf32>
    %54 = arith.addf %49, %53 : vector<16x4xf32>
    %cst_23 = arith.constant dense<0.000000e+00> : vector<8x4xf32>
    %55 = tpu.matmul %0, %54, %cst_23 {dimension_numbers = #tpu.dot_dimension_numbers<[1], [0], [0], [1], [0, 0, 1, 1], [], []>} : vector<8x16xf32>, vector<16x4xf32>, vector<8x4xf32> -> vector<8x4xf32>
    %cst_24 = arith.constant 9.99999996E-13 : f32
    %56 = vector.broadcast %cst_24 : f32 to vector<8x4xf32>
    %57 = arith.addf %55, %56 : vector<8x4xf32>
    %58 = math.sqrt %57 : vector<8x4xf32>
    %c0_25 = arith.constant 0 : index
    %c2 = arith.constant 2 : index
    %c0_26 = arith.constant 0 : index
    %c0_27 = arith.constant 0 : index
    %59 = vector.load %arg4[%c0_25, %c2, %c0_26, %c0_27] : memref<1x8x8x4xf32, #tpu.memory_space<vmem>>, vector<1x1x8x4xf32>
    %60 = vector.shape_cast %59 : vector<1x1x8x4xf32> to vector<8x4xf32>
    %61 = vector.shape_cast %58 : vector<8x4xf32> to vector<1x1x8x4xf32>
    tpu.vector_store %arg4[%c0_25, %c2, %c0_26, %c0_27], %61 {strides = array<i32>} : memref<1x8x8x4xf32, #tpu.memory_space<vmem>>, vector<1x1x8x4xf32>,
    %62 = vector.extract_strided_slice %3 {offsets = [5, 0, 0], sizes = [1, 16, 4], strides = [1, 1, 1]} : vector<16x16x4xf32> to vector<1x16x4xf32>
    %63 = vector.shape_cast %62 : vector<1x16x4xf32> to vector<16x4xf32>
    %cst_28 = arith.constant 2.500000e-01 : f32
    %64 = vector.broadcast %cst_28 : f32 to vector<16x4xf32>
    %65 = arith.mulf %63, %64 : vector<16x4xf32>
    %66 = vector.extract_strided_slice %3 {offsets = [6, 0, 0], sizes = [1, 16, 4], strides = [1, 1, 1]} : vector<16x16x4xf32> to vector<1x16x4xf32>
    %67 = vector.shape_cast %66 : vector<1x16x4xf32> to vector<16x4xf32>
    %cst_29 = arith.constant 5.000000e-01 : f32
    %68 = vector.broadcast %cst_29 : f32 to vector<16x4xf32>
    %69 = arith.mulf %67, %68 : vector<16x4xf32>
    %70 = arith.addf %65, %69 : vector<16x4xf32>
    %71 = vector.extract_strided_slice %3 {offsets = [7, 0, 0], sizes = [1, 16, 4], strides = [1, 1, 1]} : vector<16x16x4xf32> to vector<1x16x4xf32>
    %72 = vector.shape_cast %71 : vector<1x16x4xf32> to vector<16x4xf32>
    %cst_30 = arith.constant 2.500000e-01 : f32
    %73 = vector.broadcast %cst_30 : f32 to vector<16x4xf32>
    %74 = arith.mulf %72, %73 : vector<16x4xf32>
    %75 = arith.addf %70, %74 : vector<16x4xf32>
    %cst_31 = arith.constant dense<0.000000e+00> : vector<8x4xf32>
    %76 = tpu.matmul %0, %75, %cst_31 {dimension_numbers = #tpu.dot_dimension_numbers<[1], [0], [0], [1], [0, 0, 1, 1], [], []>} : vector<8x16xf32>, vector<16x4xf32>, vector<8x4xf32> -> vector<8x4xf32>
    %cst_32 = arith.constant 9.99999996E-13 : f32
    %77 = vector.broadcast %cst_32 : f32 to vector<8x4xf32>
    %78 = arith.addf %76, %77 : vector<8x4xf32>
    %79 = math.sqrt %78 : vector<8x4xf32>
    %c0_33 = arith.constant 0 : index
    %c3 = arith.constant 3 : index
    %c0_34 = arith.constant 0 : index
    %c0_35 = arith.constant 0 : index
    %80 = vector.load %arg4[%c0_33, %c3, %c0_34, %c0_35] : memref<1x8x8x4xf32, #tpu.memory_space<vmem>>, vector<1x1x8x4xf32>
    %81 = vector.shape_cast %80 : vector<1x1x8x4xf32> to vector<8x4xf32>
    %82 = vector.shape_cast %79 : vector<8x4xf32> to vector<1x1x8x4xf32>
    tpu.vector_store %arg4[%c0_33, %c3, %c0_34, %c0_35], %82 {strides = array<i32>} : memref<1x8x8x4xf32, #tpu.memory_space<vmem>>, vector<1x1x8x4xf32>,
    %83 = vector.extract_strided_slice %3 {offsets = [7, 0, 0], sizes = [1, 16, 4], strides = [1, 1, 1]} : vector<16x16x4xf32> to vector<1x16x4xf32>
    %84 = vector.shape_cast %83 : vector<1x16x4xf32> to vector<16x4xf32>
    %cst_36 = arith.constant 2.500000e-01 : f32
    %85 = vector.broadcast %cst_36 : f32 to vector<16x4xf32>
    %86 = arith.mulf %84, %85 : vector<16x4xf32>
    %87 = vector.extract_strided_slice %3 {offsets = [8, 0, 0], sizes = [1, 16, 4], strides = [1, 1, 1]} : vector<16x16x4xf32> to vector<1x16x4xf32>
    %88 = vector.shape_cast %87 : vector<1x16x4xf32> to vector<16x4xf32>
    %cst_37 = arith.constant 5.000000e-01 : f32
    %89 = vector.broadcast %cst_37 : f32 to vector<16x4xf32>
    %90 = arith.mulf %88, %89 : vector<16x4xf32>
    %91 = arith.addf %86, %90 : vector<16x4xf32>
    %92 = vector.extract_strided_slice %3 {offsets = [9, 0, 0], sizes = [1, 16, 4], strides = [1, 1, 1]} : vector<16x16x4xf32> to vector<1x16x4xf32>
    %93 = vector.shape_cast %92 : vector<1x16x4xf32> to vector<16x4xf32>
    %cst_38 = arith.constant 2.500000e-01 : f32
    %94 = vector.broadcast %cst_38 : f32 to vector<16x4xf32>
    %95 = arith.mulf %93, %94 : vector<16x4xf32>
    %96 = arith.addf %91, %95 : vector<16x4xf32>
    %cst_39 = arith.constant dense<0.000000e+00> : vector<8x4xf32>
    %97 = tpu.matmul %0, %96, %cst_39 {dimension_numbers = #tpu.dot_dimension_numbers<[1], [0], [0], [1], [0, 0, 1, 1], [], []>} : vector<8x16xf32>, vector<16x4xf32>, vector<8x4xf32> -> vector<8x4xf32>
    %cst_40 = arith.constant 9.99999996E-13 : f32
    %98 = vector.broadcast %cst_40 : f32 to vector<8x4xf32>
    %99 = arith.addf %97, %98 : vector<8x4xf32>
    %100 = math.sqrt %99 : vector<8x4xf32>
    %c0_41 = arith.constant 0 : index
    %c4 = arith.constant 4 : index
    %c0_42 = arith.constant 0 : index
    %c0_43 = arith.constant 0 : index
    %101 = vector.load %arg4[%c0_41, %c4, %c0_42, %c0_43] : memref<1x8x8x4xf32, #tpu.memory_space<vmem>>, vector<1x1x8x4xf32>
    %102 = vector.shape_cast %101 : vector<1x1x8x4xf32> to vector<8x4xf32>
    %103 = vector.shape_cast %100 : vector<8x4xf32> to vector<1x1x8x4xf32>
    tpu.vector_store %arg4[%c0_41, %c4, %c0_42, %c0_43], %103 {strides = array<i32>} : memref<1x8x8x4xf32, #tpu.memory_space<vmem>>, vector<1x1x8x4xf32>,
    %104 = vector.extract_strided_slice %3 {offsets = [9, 0, 0], sizes = [1, 16, 4], strides = [1, 1, 1]} : vector<16x16x4xf32> to vector<1x16x4xf32>
    %105 = vector.shape_cast %104 : vector<1x16x4xf32> to vector<16x4xf32>
    %cst_44 = arith.constant 2.500000e-01 : f32
    %106 = vector.broadcast %cst_44 : f32 to vector<16x4xf32>
    %107 = arith.mulf %105, %106 : vector<16x4xf32>
    %108 = vector.extract_strided_slice %3 {offsets = [10, 0, 0], sizes = [1, 16, 4], strides = [1, 1, 1]} : vector<16x16x4xf32> to vector<1x16x4xf32>
    %109 = vector.shape_cast %108 : vector<1x16x4xf32> to vector<16x4xf32>
    %cst_45 = arith.constant 5.000000e-01 : f32
    %110 = vector.broadcast %cst_45 : f32 to vector<16x4xf32>
    %111 = arith.mulf %109, %110 : vector<16x4xf32>
    %112 = arith.addf %107, %111 : vector<16x4xf32>
    %113 = vector.extract_strided_slice %3 {offsets = [11, 0, 0], sizes = [1, 16, 4], strides = [1, 1, 1]} : vector<16x16x4xf32> to vector<1x16x4xf32>
    %114 = vector.shape_cast %113 : vector<1x16x4xf32> to vector<16x4xf32>
    %cst_46 = arith.constant 2.500000e-01 : f32
    %115 = vector.broadcast %cst_46 : f32 to vector<16x4xf32>
    %116 = arith.mulf %114, %115 : vector<16x4xf32>
    %117 = arith.addf %112, %116 : vector<16x4xf32>
    %cst_47 = arith.constant dense<0.000000e+00> : vector<8x4xf32>
    %118 = tpu.matmul %0, %117, %cst_47 {dimension_numbers = #tpu.dot_dimension_numbers<[1], [0], [0], [1], [0, 0, 1, 1], [], []>} : vector<8x16xf32>, vector<16x4xf32>, vector<8x4xf32> -> vector<8x4xf32>
    %cst_48 = arith.constant 9.99999996E-13 : f32
    %119 = vector.broadcast %cst_48 : f32 to vector<8x4xf32>
    %120 = arith.addf %118, %119 : vector<8x4xf32>
    %121 = math.sqrt %120 : vector<8x4xf32>
    %c0_49 = arith.constant 0 : index
    %c5 = arith.constant 5 : index
    %c0_50 = arith.constant 0 : index
    %c0_51 = arith.constant 0 : index
    %122 = vector.load %arg4[%c0_49, %c5, %c0_50, %c0_51] : memref<1x8x8x4xf32, #tpu.memory_space<vmem>>, vector<1x1x8x4xf32>
    %123 = vector.shape_cast %122 : vector<1x1x8x4xf32> to vector<8x4xf32>
    %124 = vector.shape_cast %121 : vector<8x4xf32> to vector<1x1x8x4xf32>
    tpu.vector_store %arg4[%c0_49, %c5, %c0_50, %c0_51], %124 {strides = array<i32>} : memref<1x8x8x4xf32, #tpu.memory_space<vmem>>, vector<1x1x8x4xf32>,
    %125 = vector.extract_strided_slice %3 {offsets = [11, 0, 0], sizes = [1, 16, 4], strides = [1, 1, 1]} : vector<16x16x4xf32> to vector<1x16x4xf32>
    %126 = vector.shape_cast %125 : vector<1x16x4xf32> to vector<16x4xf32>
    %cst_52 = arith.constant 2.500000e-01 : f32
    %127 = vector.broadcast %cst_52 : f32 to vector<16x4xf32>
    %128 = arith.mulf %126, %127 : vector<16x4xf32>
    %129 = vector.extract_strided_slice %3 {offsets = [12, 0, 0], sizes = [1, 16, 4], strides = [1, 1, 1]} : vector<16x16x4xf32> to vector<1x16x4xf32>
    %130 = vector.shape_cast %129 : vector<1x16x4xf32> to vector<16x4xf32>
    %cst_53 = arith.constant 5.000000e-01 : f32
    %131 = vector.broadcast %cst_53 : f32 to vector<16x4xf32>
    %132 = arith.mulf %130, %131 : vector<16x4xf32>
    %133 = arith.addf %128, %132 : vector<16x4xf32>
    %134 = vector.extract_strided_slice %3 {offsets = [13, 0, 0], sizes = [1, 16, 4], strides = [1, 1, 1]} : vector<16x16x4xf32> to vector<1x16x4xf32>
    %135 = vector.shape_cast %134 : vector<1x16x4xf32> to vector<16x4xf32>
    %cst_54 = arith.constant 2.500000e-01 : f32
    %136 = vector.broadcast %cst_54 : f32 to vector<16x4xf32>
    %137 = arith.mulf %135, %136 : vector<16x4xf32>
    %138 = arith.addf %133, %137 : vector<16x4xf32>
    %cst_55 = arith.constant dense<0.000000e+00> : vector<8x4xf32>
    %139 = tpu.matmul %0, %138, %cst_55 {dimension_numbers = #tpu.dot_dimension_numbers<[1], [0], [0], [1], [0, 0, 1, 1], [], []>} : vector<8x16xf32>, vector<16x4xf32>, vector<8x4xf32> -> vector<8x4xf32>
    %cst_56 = arith.constant 9.99999996E-13 : f32
    %140 = vector.broadcast %cst_56 : f32 to vector<8x4xf32>
    %141 = arith.addf %139, %140 : vector<8x4xf32>
    %142 = math.sqrt %141 : vector<8x4xf32>
    %c0_57 = arith.constant 0 : index
    %c6 = arith.constant 6 : index
    %c0_58 = arith.constant 0 : index
    %c0_59 = arith.constant 0 : index
    %143 = vector.load %arg4[%c0_57, %c6, %c0_58, %c0_59] : memref<1x8x8x4xf32, #tpu.memory_space<vmem>>, vector<1x1x8x4xf32>
    %144 = vector.shape_cast %143 : vector<1x1x8x4xf32> to vector<8x4xf32>
    %145 = vector.shape_cast %142 : vector<8x4xf32> to vector<1x1x8x4xf32>
    tpu.vector_store %arg4[%c0_57, %c6, %c0_58, %c0_59], %145 {strides = array<i32>} : memref<1x8x8x4xf32, #tpu.memory_space<vmem>>, vector<1x1x8x4xf32>,
    %146 = vector.extract_strided_slice %3 {offsets = [13, 0, 0], sizes = [1, 16, 4], strides = [1, 1, 1]} : vector<16x16x4xf32> to vector<1x16x4xf32>
    %147 = vector.shape_cast %146 : vector<1x16x4xf32> to vector<16x4xf32>
    %cst_60 = arith.constant 2.500000e-01 : f32
    %148 = vector.broadcast %cst_60 : f32 to vector<16x4xf32>
    %149 = arith.mulf %147, %148 : vector<16x4xf32>
    %150 = vector.extract_strided_slice %3 {offsets = [14, 0, 0], sizes = [1, 16, 4], strides = [1, 1, 1]} : vector<16x16x4xf32> to vector<1x16x4xf32>
    %151 = vector.shape_cast %150 : vector<1x16x4xf32> to vector<16x4xf32>
    %cst_61 = arith.constant 5.000000e-01 : f32
    %152 = vector.broadcast %cst_61 : f32 to vector<16x4xf32>
    %153 = arith.mulf %151, %152 : vector<16x4xf32>
    %154 = arith.addf %149, %153 : vector<16x4xf32>
    %155 = vector.extract_strided_slice %3 {offsets = [15, 0, 0], sizes = [1, 16, 4], strides = [1, 1, 1]} : vector<16x16x4xf32> to vector<1x16x4xf32>
    %156 = vector.shape_cast %155 : vector<1x16x4xf32> to vector<16x4xf32>
    %cst_62 = arith.constant 2.500000e-01 : f32
    %157 = vector.broadcast %cst_62 : f32 to vector<16x4xf32>
    %158 = arith.mulf %156, %157 : vector<16x4xf32>
    %159 = arith.addf %154, %158 : vector<16x4xf32>
    %cst_63 = arith.constant dense<0.000000e+00> : vector<8x4xf32>
    %160 = tpu.matmul %0, %159, %cst_63 {dimension_numbers = #tpu.dot_dimension_numbers<[1], [0], [0], [1], [0, 0, 1, 1], [], []>} : vector<8x16xf32>, vector<16x4xf32>, vector<8x4xf32> -> vector<8x4xf32>
    %cst_64 = arith.constant 9.99999996E-13 : f32
    %161 = vector.broadcast %cst_64 : f32 to vector<8x4xf32>
    %162 = arith.addf %160, %161 : vector<8x4xf32>
    %163 = math.sqrt %162 : vector<8x4xf32>
    %c0_65 = arith.constant 0 : index
    %c7 = arith.constant 7 : index
    %c0_66 = arith.constant 0 : index
    %c0_67 = arith.constant 0 : index
    %164 = vector.load %arg4[%c0_65, %c7, %c0_66, %c0_67] : memref<1x8x8x4xf32, #tpu.memory_space<vmem>>, vector<1x1x8x4xf32>
    %165 = vector.shape_cast %164 : vector<1x1x8x4xf32> to vector<8x4xf32>
    %166 = vector.shape_cast %163 : vector<8x4xf32> to vector<1x1x8x4xf32>
    tpu.vector_store %arg4[%c0_65, %c7, %c0_66, %c0_67], %166 {strides = array<i32>} : memref<1x8x8x4xf32, #tpu.memory_space<vmem>>, vector<1x1x8x4xf32>,
    return
  }
  func.func @transform_0(%arg0: i32, %arg1: i32) -> (i32, i32) {
    %c0_i32 = arith.constant 0 : i32
    %c0_i32_0 = arith.constant 0 : i32
    %c0_i32_1 = arith.constant 0 : i32
    return %c0_i32, %c0_i32_0 : i32, i32
  }
  func.func @transform_1(%arg0: i32, %arg1: i32) -> (i32, i32, i32, i32) {
    %c0_i32 = arith.constant 0 : i32
    %c0_i32_0 = arith.constant 0 : i32
    %c0_i32_1 = arith.constant 0 : i32
    return %arg0, %c0_i32, %c0_i32_0, %arg1 : i32, i32, i32, i32
  }
  func.func @transform_2(%arg0: i32, %arg1: i32) -> (i32, i32, i32, i32) {
    %c0_i32 = arith.constant 0 : i32
    %c0_i32_0 = arith.constant 0 : i32
    %c0_i32_1 = arith.constant 0 : i32
    return %arg0, %c0_i32, %c0_i32_0, %arg1 : i32, i32, i32, i32
  }
}

</mosaic_0001>

<bundles_post_ra>
// kernel: tpu_custom_call.1
= control target key start
LH: loop header
LB: loop body
LE: loop exit
PB: predicated region body
PF: predicated region fallthrough
CT: control target
= control target key end

     0   :  { %s768_s9 = smov 0   ;;  %s770_s10 = smov 0   ;;  %s940_s0 = inlined_call_operand.vmem [shape: f32[8,16], index: 0, kind: input, shape index: {}]   ;;  %s941_s1 = inlined_call_operand.vmem [shape: f32[2,16,16,4], index: 1, kind: input, shape index: {}]   ;;  %s942_s2 = inlined_call_operand.vmem [shape: f32[2,8,8,4], index: 2, kind: output, shape index: {}]  }
   0x1   :  { %s772_s11 = smov 0  }
   0x2 LB: > { %s24_s12 = sadd.s32 1, %s747_s10  ;;  %p665_p0 = scmp.ge.s32.totalorder %s751_s11, 1  ;;  %s751_s11 = sphi %s772_s11, %s12_s11   ;;  %s747_s10 = sphi %s770_s10, %s944_s10   ;;  %s743_s9 = sphi %s768_s9, %s943_s9  }
   0x3   : > { %p26_p1 = scmp.ge.s32.totalorder %s24_s12, 2  ;;  %p131_p2 = scmp.lt.s32.totalorder %s751_s11, 3 }
   0x5   : > { %s946_s12 = smov (%p26_p1, %s24_s12), 0  ;;  %p132_p3 = pnand %p665_p0, %p131_p2 }
   0x6   : > { %p159_p4 = scmp.lt.s32.totalorder (!%p132_p3), %s743_s9, 1 }
   0x7   : > { %135 = sbr.rel (%p132_p3) target bundleno = 200 (0xc8), region = 28 }
   0xc   : > { %s948_s9 = smov (!%p159_p4, %s743_s9), 1  ;;  %vm246_vm0 = vcmask 130048   ;;  %v814_v40 = vld [vmem:[%s940_s0] sm:$0xff]  ;;  %vm282_vm1 = vcmask 31744  }
   0xd   : > { %s687_s13 = sshll.u32 %s948_s9, 8  ;;  %s688_s19 = sshll.u32 %s948_s9, 6 }
   0xe   : > { %s792_s16 = scalar_lea.vmem %s941_s1, %s687_s13  ;;  %s867_s22 = scalar_lea.vmem %s942_s2, %s688_s19 }
   0xf   : > { %v177_v0 = vld [vmem:[%s792_s16 + $0x8] sm:$0xff]  ;;  %v179_v1 = vld [vmem:[%s792_s16 + $0x18] sm:$0xff]  ;;  %v176_v2 = vld [vmem:[%s792_s16] sm:$0xff] }
  0x10   : > { %v209_v3 = vmul.f32 %v177_v0, %v177_v0  ;;  %v211_v4 = vmul.f32 %v179_v1, %v179_v1  ;;  %v178_v5 = vld [vmem:[%s792_s16 + $0x10] sm:$0xff]  ;;  %v208_v6 = vmul.f32 %v176_v2, %v176_v2  ;;  %v181_v7 = vld [vmem:[%s792_s16 + $0x28] sm:$0xff]  ;;  %v183_v8 = vld [vmem:[%s792_s16 + $0x38] sm:$0xff] }
  0x11   : > { %v210_v9 = vmul.f32 %v178_v5, %v178_v5  ;;  %v213_v10 = vmul.f32 %v181_v7, %v181_v7  ;;  %v215_v11 = vmul.f32 %v183_v8, %v183_v8  ;;  %v185_v12 = vld [vmem:[%s792_s16 + $0x48] sm:$0xff]  ;;  %v187_v13 = vld [vmem:[%s792_s16 + $0x58] sm:$0xff]  ;;  %v180_v20 = vld [vmem:[%s792_s16 + $0x20] sm:$0xff] }
  0x12   : > { %v189_v14 = vld [vmem:[%s792_s16 + $0x68] sm:$0xff]  ;;  %v241_v15 = vmul.f32 0.5, %v209_v3  ;;  %v243_v16 = vmul.f32 0.25, %v211_v4  ;;  %v240_v17 = vmul.f32 0.5, %v208_v6  ;;  %v217_v18 = vmul.f32 %v185_v12, %v185_v12  ;;  %v191_v19 = vld [vmem:[%s792_s16 + $0x78] sm:$0xff]  ;;  %v182_v25 = vld [vmem:[%s792_s16 + $0x30] sm:$0xff] }
  0x13   : > { %v242_v21 = vmul.f32 0.25, %v210_v9  ;;  %v285_v22 = vmul.f32 0.5, %v213_v10  ;;  %v289_v23 = vmul.f32 0.25, %v215_v11  ;;  %v219_v24 = vmul.f32 %v187_v13, %v187_v13  ;;  %v184_v30 = vld [vmem:[%s792_s16 + $0x40] sm:$0xff]  ;;  %v186_v31 = vld [vmem:[%s792_s16 + $0x50] sm:$0xff]  ;;  %v199_v47 = vld [vmem:[%s792_s16 + $0xb8] sm:$0xff] }
  0x14   : > { %v245_v26 = vadd.f32 %v243_v16, %v241_v15  ;;  %v327_v27 = vmul.f32 0.5, %v217_v18  ;;  %v221_v28 = vmul.f32 %v189_v14, %v189_v14  ;;  %v223_v29 = vmul.f32 %v191_v19, %v191_v19  ;;  %v188_v36 = vld [vmem:[%s792_s16 + $0x60] sm:$0xff]  ;;  %v190_v42 = vld [vmem:[%s792_s16 + $0x70] sm:$0xff]  ;;  %v201_v48 = vld [vmem:[%s792_s16 + $0xc8] sm:$0xff] }
  0x15   : > { %v244_v32 = vadd.f32 %v242_v21, %v240_v17  ;;  %v287_v33 = vadd.f32 %v285_v22, %v243_v16  ;;  %v331_v34 = vmul.f32 0.25, %v219_v24  ;;  %v212_v35 = vmul.f32 %v180_v20, %v180_v20  ;;  %v203_v53 = vld [vmem:[%s792_s16 + $0xd8] sm:$0xff]  ;;  %v205_v58 = vld [vmem:[%s792_s16 + $0xe8] sm:$0xff]  ;;  %v198_v10 = vld [vmem:[%s792_s16 + $0xb0] sm:$0xff] }
  0x16   : > { %264 = vmatpush.msra.mxu0 %v245_v26  ;;  %v329_v37 = vadd.f32 %v327_v27, %v289_v23  ;;  %v369_v38 = vmul.f32 0.5, %v221_v28  ;;  %v809_v39 = vmul.f32 0.25, %v223_v29  ;;  %v214_v41 = vmul.f32 %v182_v25, %v182_v25  ;;  %v207_v63 = vld [vmem:[%s792_s16 + $0xf8] sm:$0xff]  ;;  %v193_v0 = vld [vmem:[%s792_s16 + $0x88] sm:$0xff]  ;;  %v200_v11 = vld [vmem:[%s792_s16 + $0xc0] sm:$0xff] }
  0x17   : > { %v291_v43 = vadd.f32 %v289_v23, %v287_v33  ;;  %v284_v44 = vmul.f32 0.5, %v212_v35  ;;  %v216_v45 = vmul.f32 %v184_v30, %v184_v30  ;;  %v218_v46 = vmul.f32 %v186_v31, %v186_v31  ;;  %v195_v5 = vld [vmem:[%s792_s16 + $0x98] sm:$0xff]  ;;  %v202_v16 = vld [vmem:[%s792_s16 + $0xd0] sm:$0xff]  ;;  %v192_v27 = vld [vmem:[%s792_s16 + $0x80] sm:$0xff] }
  0x18   : > { %265 = vmatpush.msra.mxu0 %v244_v32  ;;  %v333_v49 = vadd.f32 %v331_v34, %v329_v37  ;;  %v371_v50 = vadd.f32 %v369_v38, %v331_v34  ;;  %v288_v51 = vmul.f32 0.25, %v214_v41  ;;  %v220_v52 = vmul.f32 %v188_v36, %v188_v36  ;;  %v206_v26 = vld [vmem:[%s792_s16 + $0xf0] sm:$0xff]  ;;  %v197_v37 = vld [vmem:[%s792_s16 + $0xa8] sm:$0xff]  ;;  %v196_v38 = vld [vmem:[%s792_s16 + $0xa0] sm:$0xff] }
  0x19   : > { %306 = vmatpush.msra.mxu1 %v291_v43  ;;  %670 = vmatmul.msk.f32.vlgmr.msra.gmra.mxu0 %vm246_vm0, %v814_v40  ;;  %v286_v54 = vadd.f32 %v284_v44, %v242_v21  ;;  %v326_v55 = vmul.f32 0.5, %v216_v45  ;;  %v330_v56 = vmul.f32 0.25, %v218_v46  ;;  %v222_v57 = vmul.f32 %v190_v42, %v190_v42  ;;  %v204_v21 = vld [vmem:[%s792_s16 + $0xe0] sm:$0xff]  ;;  %v194_v32 = vld [vmem:[%s792_s16 + $0x90] sm:$0xff] }
  0x1a   : > { %348 = vmatpush.msra.mxu2 %v333_v49  ;;  %v375_v59 = vadd.f32 %v809_v39, %v371_v50  ;;  %v368_v60 = vmul.f32 0.5, %v220_v52  ;;  %v231_v61 = vmul.f32 %v199_v47, %v199_v47  ;;  %v233_v62 = vmul.f32 %v201_v48, %v201_v48 }
  0x1b   : > { %v290_v1 = vadd.f32 %v288_v51, %v286_v54  ;;  %v328_v2 = vadd.f32 %v326_v55, %v288_v51  ;;  %v372_v3 = vmul.f32 0.25, %v222_v57  ;;  %v235_v4 = vmul.f32 %v203_v53, %v203_v53 }
  0x1c   : > { %390 = vmatpush.msra.mxu3 %v375_v59  ;;  %v370_v6 = vadd.f32 %v368_v60, %v330_v56  ;;  %v827_v7 = vmul.f32 0.25, %v231_v61  ;;  %v495_v8 = vmul.f32 0.5, %v233_v62  ;;  %v237_v9 = vmul.f32 %v205_v58, %v205_v58 }
  0x1d   : > { %307 = vmatpush.msra.mxu1 %v290_v1  ;;  %v332_v12 = vadd.f32 %v330_v56, %v328_v2  ;;  %v499_v13 = vmul.f32 0.25, %v235_v4  ;;  %v239_v14 = vmul.f32 %v207_v63, %v207_v63  ;;  %v225_v15 = vmul.f32 %v193_v0, %v193_v0 }
  0x1e   : > { %v374_v17 = vadd.f32 %v372_v3, %v370_v6  ;;  %671 = vmatmul.msk.f32.vlgmr.msra.gmra.mxu1 %vm246_vm0, %v814_v40  ;;  %v497_v18 = vadd.f32 %v495_v8, %v827_v7  ;;  %v537_v19 = vmul.f32 0.5, %v237_v9  ;;  %v227_v20 = vmul.f32 %v195_v5, %v195_v5 }
  0x1f   : > { %349 = vmatpush.msra.mxu2 %v332_v12  ;;  %v541_v22 = vmul.f32 0.25, %v239_v14  ;;  %v411_v23 = vmul.f32 0.5, %v225_v15  ;;  %v230_v24 = vmul.f32 %v198_v10, %v198_v10  ;;  %v232_v25 = vmul.f32 %v200_v11, %v200_v11 }
  0x20   : > { %391 = vmatpush.msra.mxu3 %v374_v17  ;;  %673 = vmatmul.msk.f32.vlgmr.msra.gmra.mxu2 %vm246_vm0, %v814_v40  ;;  %v501_v28 = vadd.f32 %v499_v13, %v497_v18  ;;  %v539_v29 = vadd.f32 %v537_v19, %v499_v13  ;;  %v415_v30 = vmul.f32 0.25, %v227_v20  ;;  %v234_v31 = vmul.f32 %v202_v16, %v202_v16 }
  0x21   : > { %675 = vmatmul.msk.f32.vlgmr.msra.gmra.mxu3 %vm246_vm0, %v814_v40  ;;  %v413_v33 = vadd.f32 %v411_v23, %v809_v39  ;;  %v456_v34 = vmul.f32 0.25, %v230_v24  ;;  %v494_v35 = vmul.f32 0.5, %v232_v25  ;;  %v236_v36 = vmul.f32 %v204_v21, %v204_v21 }
  0x22   : > { %516 = vmatpush.msrb.mxu2 %v501_v28  ;;  %v543_v41 = vadd.f32 %v541_v22, %v539_v29  ;;  %v498_v42 = vmul.f32 0.25, %v234_v31  ;;  %v238_v43 = vmul.f32 %v206_v26, %v206_v26  ;;  %v224_v44 = vmul.f32 %v192_v27, %v192_v27 }
  0x23   : > { %v417_v45 = vadd.f32 %v415_v30, %v413_v33  ;;  %v496_v46 = vadd.f32 %v494_v35, %v456_v34  ;;  %v536_v47 = vmul.f32 0.5, %v236_v36  ;;  %v226_v48 = vmul.f32 %v194_v32, %v194_v32 }
  0x24   : > { %558 = vmatpush.msrb.mxu3 %v543_v41  ;;  %v540_v49 = vmul.f32 0.25, %v238_v43  ;;  %v410_v50 = vmul.f32 0.5, %v224_v44  ;;  %v229_v51 = vmul.f32 %v197_v37, %v197_v37  ;;  %v228_v52 = vmul.f32 %v196_v38, %v196_v38 }
  0x25   : > { %432 = vmatpush.msrb.mxu0 %v417_v45  ;;  %v500_v39 = vadd.f32 %v498_v42, %v496_v46  ;;  %v538_v53 = vadd.f32 %v536_v47, %v498_v42  ;;  %v414_v54 = vmul.f32 0.25, %v226_v48 }
  0x26   : > { %v412_v55 = vadd.f32 %v410_v50, %v372_v3  ;;  %v453_v56 = vmul.f32 0.5, %v229_v51  ;;  %v452_v57 = vmul.f32 0.5, %v228_v52 }
  0x27   : > { %517 = vmatpush.msrb.mxu2 %v500_v39  ;;  %v542_v58 = vadd.f32 %v540_v49, %v538_v53 }
  0x28   : > { %v416_v59 = vadd.f32 %v414_v54, %v412_v55  ;;  %v455_v60 = vadd.f32 %v453_v56, %v415_v30  ;;  %v454_v61 = vadd.f32 %v452_v57, %v414_v54  ;;  %681 = vmatmul.msk.f32.vlgmr.msrb.gmra.mxu2 %vm246_vm0, %v814_v40 }
  0x29   : > { %559 = vmatpush.msrb.mxu3 %v542_v58 }
  0x2a   : > { %433 = vmatpush.msrb.mxu0 %v416_v59  ;;  %v459_v62 = vadd.f32 %v827_v7, %v455_v60  ;;  %v458_v63 = vadd.f32 %v456_v34, %v454_v61  ;;  %683 = vmatmul.msk.f32.vlgmr.msrb.gmra.mxu3 %vm246_vm0, %v814_v40 }
  0x2b   : > { %677 = vmatmul.msk.f32.vlgmr.msrb.gmra.mxu0 %vm246_vm0, %v814_v40 }
  0x2c   : > { %474 = vmatpush.msrb.mxu1 %v459_v62 }
  0x2e   : > { %475 = vmatpush.msrb.mxu1 %v458_v63 }
  0x2f   : > { %679 = vmatmul.msk.f32.vlgmr.msrb.gmra.mxu1 %vm246_vm0, %v814_v40 }
  0x96   : > { %v267_v0 = vpop.f32.mrf.mxu0 }
  0x97   : > { %v268_v1 = vadd.f32 1e-12, %v267_v0 }
  0x99   : > { %713 = vrsqrt.f32 %v268_v1  ;;  %vm277_vm2 = vcmp.eq.f32.partialorder %v268_v1, inf  ;;  %v280_v20 = vand.u32 2147483648, %v268_v1  ;;  %vm279_vm3 = vcmp.eq.f32.partialorder %v268_v1, 0.0 }
  0x9b   : > { %v309_v2 = vpop.f32.mrf.mxu1 }
  0x9c   : > { %v310_v3 = vadd.f32 1e-12, %v309_v2 }
  0x9e   : > { %715 = vrsqrt.f32 %v310_v3  ;;  %vm319_vm4 = vcmp.eq.f32.partialorder %v310_v3, inf  ;;  %v322_v36 = vand.u32 2147483648, %v310_v3  ;;  %vm321_vm5 = vcmp.eq.f32.partialorder %v310_v3, 0.0 }
  0x9f   : > { %v714_v4 = vpop.eup %713 }
  0xa0   : > { %v271_v5 = vmul.f32 %v714_v4, %v268_v1 }
  0xa2   : > { %v272_v6 = vmul.f32 %v714_v4, %v271_v5 }
  0xa3   : > { %v351_v7 = vpop.f32.mrf.mxu2 }
  0xa4   : > { %v716_v8 = vpop.eup %715  ;;  %v273_v9 = vmul.f32 0.5, %v272_v6  ;;  %v855_v10 = vadd.f32 1e-12, %v351_v7  ;;  %v393_v11 = vpop.f32.mrf.mxu3 }
  0xa5   : > { %v313_v12 = vmul.f32 %v716_v8, %v310_v3  ;;  %v857_v13 = vadd.f32 1e-12, %v393_v11 }
  0xa6   : > { %v274_v40 = vsub.f32 1.5, %v273_v9  ;;  %717 = vrsqrt.f32 %v855_v10  ;;  %vm361_vm6 = vcmp.eq.f32.partialorder %v855_v10, inf  ;;  %vm363_vm7 = vcmp.eq.f32.partialorder %v855_v10, 0.0 }
  0xa7   : > { %v314_v14 = vmul.f32 %v716_v8, %v313_v12  ;;  %719 = vrsqrt.f32 %v857_v13  ;;  %v364_v57 = vand.u32 2147483648, %v855_v10  ;;  %vm403_vm8 = vcmp.eq.f32.partialorder %v857_v13, inf }
  0xa8   : > { %v275_v15 = vmul.f32 %v714_v4, %v274_v40  ;;  %v435_v16 = vpop.f32.mrf.mxu0  ;;  %vm405_vm9 = vcmp.eq.f32.partialorder %v857_v13, 0.0  ;;  %v406_v0 = vand.u32 2147483648, %v857_v13 }
  0xa9   : > { %v315_v17 = vmul.f32 0.5, %v314_v14  ;;  %v862_v18 = vadd.f32 1e-12, %v435_v16 }
  0xaa   : > { %v276_v19 = vmul.f32 %v275_v15, %v268_v1 }
  0xab   : > { %v316_v21 = vsub.f32 1.5, %v315_v17  ;;  %721 = vrsqrt.f32 %v862_v18  ;;  %v519_v22 = vpop.f32.mrf.mxu2  ;;  %vm445_vm10 = vcmp.eq.f32.partialorder %v862_v18, inf  ;;  %v448_v11 = vand.u32 2147483648, %v862_v18 }
  0xac   : > { %v718_v23 = vpop.eup %717  ;;  %v278_v24 = vsel %vm277_vm2, %v268_v1, %v276_v19  ;;  %v477_v25 = vpop.f32.mrf.mxu1  ;;  %v870_v26 = vadd.f32 1e-12, %v519_v22  ;;  %vm447_vm11 = vcmp.eq.f32.partialorder %v862_v18, 0.0 }
  0xad   : > { %v720_v27 = vpop.eup %719  ;;  %v281_v28 = vsel %vm279_vm3, %v280_v20, %v278_v24  ;;  %v317_v29 = vmul.f32 %v716_v8, %v316_v21  ;;  %v355_v30 = vmul.f32 %v718_v23, %v855_v10  ;;  %v873_v31 = vadd.f32 1e-12, %v477_v25  ;;  %v561_v33 = vpop.f32.mrf.mxu3 }
  0xae   : > { %283 = vst.msk [vmem:[%s867_s22] sm:$0xff] %vm282_vm1, %v281_v28  ;;  %v397_v32 = vmul.f32 %v720_v27, %v857_v13  ;;  %723 = vrsqrt.f32 %v870_v26  ;;  %v880_v43 = vadd.f32 1e-12, %v561_v33  ;;  %vm529_vm12 = vcmp.eq.f32.partialorder %v870_v26, inf }
  0xaf   : > { %v318_v34 = vmul.f32 %v317_v29, %v310_v3  ;;  %v356_v35 = vmul.f32 %v718_v23, %v355_v30  ;;  %725 = vrsqrt.f32 %v873_v31  ;;  %vm531_vm13 = vcmp.eq.f32.partialorder %v870_v26, 0.0 }
  0xb0   : > { %v398_v37 = vmul.f32 %v720_v27, %v397_v32  ;;  %727 = vrsqrt.f32 %v880_v43  ;;  %v532_v20 = vand.u32 2147483648, %v870_v26  ;;  %vm487_vm14 = vcmp.eq.f32.partialorder %v873_v31, inf }
  0xb1   : > { %v722_v38 = vpop.eup %721  ;;  %v320_v41 = vsel %vm319_vm4, %v310_v3, %v318_v34  ;;  %v357_v42 = vmul.f32 0.5, %v356_v35  ;;  %vm489_vm15 = vcmp.eq.f32.partialorder %v873_v31, 0.0  ;;  %vm571_vm0 = vcmp.eq.f32.partialorder %v880_v43, inf }
  0xb2   : > { %v323_v44 = vsel %vm321_vm5, %v322_v36, %v320_v41  ;;  %v399_v45 = vmul.f32 0.5, %v398_v37  ;;  %v439_v46 = vmul.f32 %v722_v38, %v862_v18  ;;  %v574_v29 = vand.u32 2147483648, %v880_v43 }
  0xb3   : > { %672 = vst.msk [vmem:[%s867_s22 + $0x8] sm:$0xff] %vm282_vm1, %v323_v44  ;;  %v358_v47 = vsub.f32 1.5, %v357_v42  ;;  %vm573_vm2 = vcmp.eq.f32.partialorder %v880_v43, 0.0 }
  0xb4   : > { %v724_v48 = vpop.eup %723  ;;  %v400_v49 = vsub.f32 1.5, %v399_v45  ;;  %v440_v50 = vmul.f32 %v722_v38, %v439_v46 }
  0xb5   : > { %v726_v51 = vpop.eup %725  ;;  %v359_v52 = vmul.f32 %v718_v23, %v358_v47  ;;  %v523_v39 = vmul.f32 %v724_v48, %v870_v26 }
  0xb6   : > { %v401_v53 = vmul.f32 %v720_v27, %v400_v49  ;;  %v441_v54 = vmul.f32 0.5, %v440_v50  ;;  %v481_v55 = vmul.f32 %v726_v51, %v873_v31  ;;  %v728_v62 = vpop.eup %727 }
  0xb7   : > { %v360_v56 = vmul.f32 %v359_v52, %v855_v10  ;;  %v524_v58 = vmul.f32 %v724_v48, %v523_v39  ;;  %v565_v8 = vmul.f32 %v728_v62, %v880_v43 }
  0xb8   : > { %v402_v59 = vmul.f32 %v401_v53, %v857_v13  ;;  %v442_v60 = vsub.f32 1.5, %v441_v54  ;;  %v482_v61 = vmul.f32 %v726_v51, %v481_v55 }
  0xb9   : > { %v362_v63 = vsel %vm361_vm6, %v855_v10, %v360_v56  ;;  %v525_v1 = vmul.f32 0.5, %v524_v58 }
  0xba   : > { %v365_v2 = vsel %vm363_vm7, %v364_v57, %v362_v63  ;;  %v404_v3 = vsel %vm403_vm8, %v857_v13, %v402_v59  ;;  %v443_v4 = vmul.f32 %v722_v38, %v442_v60  ;;  %v483_v5 = vmul.f32 0.5, %v482_v61 }
  0xbb   : > { %674 = vst.msk [vmem:[%s867_s22 + $0x10] sm:$0xff] %vm282_vm1, %v365_v2  ;;  %v407_v6 = vsel %vm405_vm9, %v406_v0, %v404_v3  ;;  %v526_v7 = vsub.f32 1.5, %v525_v1  ;;  %v566_v13 = vmul.f32 %v728_v62, %v565_v8 }
  0xbc   : > { %676 = vst.msk [vmem:[%s867_s22 + $0x18] sm:$0xff] %vm282_vm1, %v407_v6  ;;  %v444_v9 = vmul.f32 %v443_v4, %v862_v18  ;;  %v484_v10 = vsub.f32 1.5, %v483_v5 }
  0xbd   : > { %v527_v12 = vmul.f32 %v724_v48, %v526_v7  ;;  %v567_v17 = vmul.f32 0.5, %v566_v13 }
  0xbe   : > { %v446_v40 = vsel %vm445_vm10, %v862_v18, %v444_v9  ;;  %v485_v14 = vmul.f32 %v726_v51, %v484_v10  ;;  %v490_v18 = vand.u32 2147483648, %v873_v31 }
  0xbf   : > { %v449_v15 = vsel %vm447_vm11, %v448_v11, %v446_v40  ;;  %v528_v16 = vmul.f32 %v527_v12, %v870_v26  ;;  %v568_v22 = vsub.f32 1.5, %v567_v17 }
  0xc0   : > { %678 = vst.msk [vmem:[%s867_s22 + $0x20] sm:$0xff] %vm282_vm1, %v449_v15  ;;  %v486_v19 = vmul.f32 %v485_v14, %v873_v31 }
  0xc1   : > { %v530_v21 = vsel %vm529_vm12, %v870_v26, %v528_v16  ;;  %v569_v27 = vmul.f32 %v728_v62, %v568_v22 }
  0xc2   : > { %v488_v23 = vsel %vm487_vm14, %v873_v31, %v486_v19  ;;  %v533_v24 = vsel %vm531_vm13, %v532_v20, %v530_v21 }
  0xc3   : > { %v491_v25 = vsel %vm489_vm15, %v490_v18, %v488_v23  ;;  %682 = vst.msk [vmem:[%s867_s22 + $0x30] sm:$0xff] %vm282_vm1, %v533_v24  ;;  %v570_v28 = vmul.f32 %v569_v27, %v880_v43 }
  0xc4   : > { %680 = vst.msk [vmem:[%s867_s22 + $0x28] sm:$0xff] %vm282_vm1, %v491_v25 }
  0xc5   : > { %v572_v26 = vsel %vm571_vm0, %v880_v43, %v570_v28 }
  0xc6   : > { %v575_v30 = vsel %vm573_vm2, %v574_v29, %v572_v26 }
  0xc7   : > { %684 = vst.msk [vmem:[%s867_s22 + $0x38] sm:$0xff] %vm282_vm1, %v575_v30 }
  0xc8 PF: > { %s12_s11 = sadd.s32 1, %s751_s11   ;;  %s943_s9 = smov %s747_s10 }
  0xc9   : > { %p9_p5 = scmp.ge.s32.totalorder %s12_s11, 4   ;;  %s944_s10 = smov %s946_s12 }
  0xcb   :  { %11 = sbr.rel (!%p9_p5) target bundleno = 2 (0x2), region = 65 }

</bundles_post_ra>
